<compile_context>
chip_gen: v7x
topology: tpu7x:2x2x1
jax: 0.10.0
libtpu: 0.0.40
codegen_flags: <defaults>
</compile_context>

<pallas_src>
import functools

import numpy as np
import jax
import jax.numpy as jnp
from jax import lax
from jax.experimental import pallas as pl
from jax.experimental.pallas import tpu as pltpu


def _round_up(x, m):
    return ((x + m - 1) // m) * m


def _vmem_capacity_bytes():
    try:
        return int(pltpu.get_tpu_info().vmem_capacity_bytes)
    except Exception:
        return 64 << 20            # conservative default (v7x per-TensorCore VMEM)


# ----------------------------- Pallas kernels --------------------------------
def _wres_matmul_bias_relu_kernel(p_ref, w_ref, b_ref, o_ref):
    # weight-resident path: full K and full O per step, patches streamed once.
    # p_ref: (tm, K_pad) bf16, w_ref: (K_pad, O_pad) bf16, b_ref: (1, O_pad) f32
    acc = jnp.dot(p_ref[...], w_ref[...], preferred_element_type=jnp.float32)
    o_ref[...] = jnp.maximum(acc + b_ref[...], 0.0).astype(o_ref.dtype)


def _ksplit_matmul_bias_relu_f32_kernel(p_ref, w_ref, b_ref, o_ref):
    # general K-split path, f32 output: accumulate directly into the output
    # block (its block index is constant over the k axis) — no acc scratch.
    k = pl.program_id(2)

    @pl.when(k == 0)
    def _():
        o_ref[...] = jnp.zeros_like(o_ref)

    o_ref[...] += jnp.dot(p_ref[...], w_ref[...],
                          preferred_element_type=jnp.float32)

    @pl.when(k == pl.num_programs(2) - 1)
    def _():
        o_ref[...] = jnp.maximum(o_ref[...] + b_ref[...], 0.0)


def _ksplit_matmul_bias_relu_acc_kernel(p_ref, w_ref, b_ref, o_ref, acc_ref):
    # general K-split path with a narrow (e.g. bf16) output: keep an f32
    # accumulator scratch, cast on the final store.
    k = pl.program_id(2)

    @pl.when(k == 0)
    def _():
        acc_ref[...] = jnp.zeros_like(acc_ref)

    acc_ref[...] += jnp.dot(p_ref[...], w_ref[...],
                            preferred_element_type=jnp.float32)

    @pl.when(k == pl.num_programs(2) - 1)
    def _():
        y = acc_ref[...] + b_ref[...]
        o_ref[...] = jnp.maximum(y, 0.0).astype(o_ref.dtype)


# --------------------------- fused matmul wrapper -----------------------------
def _fused_matmul_bias_relu(patches, w_mat, bias, *, out_dtype=jnp.float32):
    """relu(patches @ w_mat + bias) with bf16 MXU operands, f32 accumulate.

    patches: (M, K_pad) bf16, K already zero-padded to a multiple of 128.
    w_mat:   (K_pad, O) f32 (BN scale folded, rows in (kh, kw, c) order).
    bias:    (1, O)     f32 folded BN bias.
    Returns (M, O) in out_dtype.
    """
    M, K_pad = patches.shape
    O = w_mat.shape[1]
    O_pad = _round_up(O, 128)
    ob = np.dtype(out_dtype).itemsize

    w_p = jnp.pad(w_mat, ((0, 0), (0, O_pad - O))).astype(jnp.bfloat16)
    b_p = jnp.pad(bias, ((0, 0), (0, O_pad - O))).astype(jnp.float32)

    cap = _vmem_capacity_bytes()
    budget = (cap * 3) // 8          # tile budget; double buffering counted below

    w_bytes = K_pad * O_pad * 2
    b_bytes = O_pad * 4
    row_bytes = 2 * (K_pad * 2 + O_pad * ob)   # double-buffered patch + out tile per row
    avail = budget - 2 * (w_bytes + b_bytes)

    if avail >= row_bytes * 128:
        # ---- weight-resident fast path: patches streamed from HBM exactly once.
        tm = min(2048, (avail // row_bytes) // 128 * 128)
        tm = min(tm, _round_up(M, 128))
        M_pad = _round_up(M, tm)
        if M_pad > M:
            patches = jnp.pad(patches, ((0, M_pad - M), (0, 0)))
        need = 2 * (w_bytes + b_bytes) + tm * row_bytes
        vmem_limit = int(min(cap - (8 << 20), max(need + (4 << 20), 32 << 20)))

        out = pl.pallas_call(
            _wres_matmul_bias_relu_kernel,
            out_shape=jax.ShapeDtypeStruct((M_pad, O_pad), out_dtype),
            grid_spec=pltpu.PrefetchScalarGridSpec(
                num_scalar_prefetch=0,
                grid=(M_pad // tm,),
                in_specs=[
                    pl.BlockSpec((tm, K_pad), lambda i: (i, 0)),
                    pl.BlockSpec((K_pad, O_pad), lambda i: (0, 0)),
                    pl.BlockSpec((1, O_pad), lambda i: (0, 0)),
                ],
                out_specs=pl.BlockSpec((tm, O_pad), lambda i: (i, 0)),
            ),
            compiler_params=pltpu.CompilerParams(
                dimension_semantics=("parallel",),
                vmem_limit_bytes=vmem_limit),
        )(patches, w_p, b_p)
        return out[:M, :O]

    # ---- general (M, O, K) fallback for layers whose weight does not fit VMEM.
    tn = 256 if O_pad % 256 == 0 else 128
    if K_pad % 512 == 0:
        tk = 512
    elif K_pad % 256 == 0:
        tk = 256
    else:
        tk = 128
    acc_needed = np.dtype(out_dtype) != np.dtype(jnp.float32)

    tm = 128
    for cand in (2048, 1024, 512, 256, 128):
        need = (2 * (cand * tk * 2 + tk * tn * 2 + tn * 4 + cand * tn * ob)
                + (cand * tn * 4 if acc_needed else 0))
        if need <= budget:
            tm = cand
            break
    M_pad = _round_up(M, tm)
    if M_pad > M:
        patches = jnp.pad(patches, ((0, M_pad - M), (0, 0)))
    need = (2 * (tm * tk * 2 + tk * tn * 2 + tn * 4 + tm * tn * ob)
            + (tm * tn * 4 if acc_needed else 0))
    vmem_limit = int(min(cap - (8 << 20), max(need + (4 << 20), 32 << 20)))

    kernel = (_ksplit_matmul_bias_relu_acc_kernel if acc_needed
              else _ksplit_matmul_bias_relu_f32_kernel)
    scratch = [pltpu.VMEM((tm, tn), jnp.float32)] if acc_needed else []

    out = pl.pallas_call(
        kernel,
        out_shape=jax.ShapeDtypeStruct((M_pad, O_pad), out_dtype),
        grid_spec=pltpu.PrefetchScalarGridSpec(
            num_scalar_prefetch=0,
            grid=(M_pad // tm, O_pad // tn, K_pad // tk),
            in_specs=[
                pl.BlockSpec((tm, tk), lambda i, j, k: (i, k)),
                pl.BlockSpec((tk, tn), lambda i, j, k: (k, j)),
                pl.BlockSpec((1, tn), lambda i, j, k: (0, j)),
            ],
            out_specs=pl.BlockSpec((tm, tn), lambda i, j, k: (i, j)),
            scratch_shapes=scratch,
        ),
        compiler_params=pltpu.CompilerParams(
            dimension_semantics=("parallel", "parallel", "arbitrary"),
            vmem_limit_bytes=vmem_limit),
    )(patches, w_p, b_p)
    return out[:M, :O]


# ------------------------------ glue (JAX) -----------------------------------
def _im2col_nhwc_bf16(x, kh, kw, stride, padding, k_pad):
    """(N,C,H,W) f32 -> (N*OH*OW, k_pad) bf16 patches; K layout is (KH, KW, C)."""
    n, c, h, w = x.shape
    xh = jnp.transpose(x, (0, 2, 3, 1)).astype(jnp.bfloat16)   # NHWC bf16, one small pass
    xp = jnp.pad(xh, ((0, 0), (padding, padding), (padding, padding), (0, 0)))
    oh = (h + 2 * padding - kh) // stride + 1
    ow = (w + 2 * padding - kw) // stride + 1
    cols = [xp[:, i:i + stride * oh:stride, j:j + stride * ow:stride, :]
            for i in range(kh) for j in range(kw)]
    patches = jnp.stack(cols, axis=3)           # (N, OH, OW, KH*KW, C) — already (kh,kw,c)
    patches = patches.reshape(n * oh * ow, kh * kw * c)
    k = kh * kw * c
    if k_pad > k:
        patches = jnp.pad(patches, ((0, 0), (0, k_pad - k)))
    return patches, oh, ow


def basic_conv2d(x, weight, gamma, beta, running_mean, running_var,
                 *, stride, padding, eps=1e-3, out_dtype=jnp.float32):
    """x: (N, C, H, W); weight: (O, C, KH, KW).  Returns (N, O, OH, OW)."""
    n, c, _, _ = x.shape
    o, _, kh, kw = weight.shape
    k_pad = _round_up(c * kh * kw, 128)

    patches, oh, ow = _im2col_nhwc_bf16(x, kh, kw, stride, padding, k_pad)

    # inference-mode BN fold: scale into the weight, bias separate (f32 epilogue).
    scale = gamma / jnp.sqrt(running_var + eps)                 # (O,)
    bias = (beta - running_mean * scale).reshape(1, o)          # (1, O)
    w_scaled = weight * scale.reshape(o, 1, 1, 1)               # (O, C, KH, KW)
    # rows permuted to the (kh, kw, c) patch layout; tiny array, cheap transpose.
    w_mat = jnp.transpose(w_scaled, (2, 3, 1, 0)).reshape(c * kh * kw, o)
    w_mat = jnp.pad(w_mat, ((0, k_pad - c * kh * kw), (0, 0)))  # (K_pad, O)

    out = _fused_matmul_bias_relu(patches, w_mat, bias, out_dtype=out_dtype)
    out = out.reshape(n, oh, ow, o)
    return jnp.transpose(out, (0, 3, 1, 2))                     # NCHW


# --------------------------------- main --------------------------------------
if __name__ == "__main__":
    key = jax.random.PRNGKey(0)
    kx, kw_ = jax.random.split(key)

    # BasicConv2d(in_planes=4, out_planes=8, kernel_size=3, stride=1, padding=1)
    N, C, H, W = 2, 4, 16, 16
    O, KH, KW = 8, 3, 3
    stride, padding = 1, 1
    eps = 1e-3

    x = jax.random.normal(kx, (N, C, H, W), dtype=jnp.float32)
    weight = 0.1 * jax.random.normal(kw_, (O, C, KH, KW), dtype=jnp.float32)

    # deterministic, non-trivial BN parameters (inference-mode running stats)
    gamma = jnp.linspace(0.5, 1.5, O, dtype=jnp.float32)
    beta = jnp.linspace(-0.2, 0.2, O, dtype=jnp.float32)
    running_mean = jnp.linspace(-0.1, 0.1, O, dtype=jnp.float32)
    running_var = jnp.linspace(0.8, 1.2, O, dtype=jnp.float32)

    fn = jax.jit(functools.partial(basic_conv2d, stride=stride, padding=padding,
                                   eps=eps))
    out = fn(x, weight, gamma, beta, running_mean, running_var)
    out = jax.block_until_ready(out)
    assert out.shape == (N, O, H, W)

    # ---- reference 1: same bf16 operand quantization (tight tolerance) ----
    scale = gamma / jnp.sqrt(running_var + eps)
    bias = beta - running_mean * scale
    w_scaled = weight * scale.reshape(O, 1, 1, 1)
    conv_bf16 = lax.conv_general_dilated(
        x.astype(jnp.bfloat16), w_scaled.astype(jnp.bfloat16),
        window_strides=(stride, stride),
        padding=[(padding, padding), (padding, padding)],
        dimension_numbers=("NCHW", "OIHW", "NCHW"),
        preferred_element_type=jnp.float32)
    ref_bf16 = jnp.maximum(conv_bf16 + bias.reshape(1, O, 1, 1), 0.0)
    assert jnp.allclose(out, ref_bf16, atol=2e-3, rtol=2e-3)

    # ---- reference 2: full-f32 module semantics (bf16-MXU tolerance) ----
    conv_f32 = lax.conv_general_dilated(
        x, weight, window_strides=(stride, stride),
        padding=[(padding, padding), (padding, padding)],
        dimension_numbers=("NCHW", "OIHW", "NCHW"))
    ref_f32 = jnp.maximum(conv_f32 * scale.reshape(1, O, 1, 1)
                          + bias.reshape(1, O, 1, 1), 0.0)
    assert jnp.allclose(out, ref_f32, atol=3e-2, rtol=3e-2)

    print("KERNEL_OK")
</pallas_src>

<mosaic_0001>
module attributes {stable_mosaic.version = 11 : i64} {
  func.func @_wres_matmul_bias_relu_kernel(%arg0: i32, %arg1: memref<512x128xbf16, #tpu.memory_space<vmem>>, %arg2: memref<128x128xbf16, #tpu.memory_space<vmem>>, %arg3: memref<1x128xf32, #tpu.memory_space<vmem>>, %arg4: memref<512x128xf32, #tpu.memory_space<vmem>>) attributes {dimension_semantics = [#tpu.dimension_semantics<parallel>], iteration_bounds = array<i64: 1>, scalar_prefetch = 0 : i64, scratch_operands = 0 : i64, tpu.core_type = #tpu.core_type<tc>, window_params = [{transform_indices = @transform_0, window_bounds = array<i64: 512, 128>}, {pipeline_mode = #tpu.pipeline_mode<synchronous>, transform_indices = @transform_1, window_bounds = array<i64: 128, 128>}, {pipeline_mode = #tpu.pipeline_mode<synchronous>, transform_indices = @transform_2, window_bounds = array<i64: 1, 128>}, {transform_indices = @transform_3, window_bounds = array<i64: 512, 128>}]} {
    %c0 = arith.constant 0 : index
    %c0_0 = arith.constant 0 : index
    %0 = vector.load %arg1[%c0, %c0_0] : memref<512x128xbf16, #tpu.memory_space<vmem>>, vector<512x128xbf16>
    %c0_1 = arith.constant 0 : index
    %c0_2 = arith.constant 0 : index
    %1 = vector.load %arg2[%c0_1, %c0_2] : memref<128x128xbf16, #tpu.memory_space<vmem>>, vector<128x128xbf16>
    %cst = arith.constant dense<0.000000e+00> : vector<512x128xf32>
    %2 = tpu.matmul %0, %1, %cst {dimension_numbers = #tpu.dot_dimension_numbers<[1], [0], [0], [1], [0, 0, 1, 1], [], []>} : vector<512x128xbf16>, vector<128x128xbf16>, vector<512x128xf32> -> vector<512x128xf32>
    %c0_3 = arith.constant 0 : index
    %c0_4 = arith.constant 0 : index
    %3 = vector.load %arg3[%c0_3, %c0_4] : memref<1x128xf32, #tpu.memory_space<vmem>>, vector<1x128xf32>
    %4 = vector.broadcast %3 : vector<1x128xf32> to vector<512x128xf32>
    %5 = arith.addf %2, %4 : vector<512x128xf32>
    %cst_5 = arith.constant 0.000000e+00 : f32
    %6 = vector.broadcast %cst_5 : f32 to vector<512x128xf32>
    %7 = arith.maximumf %5, %6 : vector<512x128xf32>
    %c0_6 = arith.constant 0 : index
    %c0_7 = arith.constant 0 : index
    %8 = vector.load %arg4[%c0_6, %c0_7] : memref<512x128xf32, #tpu.memory_space<vmem>>, vector<512x128xf32>
    tpu.vector_store %arg4[%c0_6, %c0_7], %7 {strides = array<i32>} : memref<512x128xf32, #tpu.memory_space<vmem>>, vector<512x128xf32>,
    return
  }
  func.func @transform_0(%arg0: i32) -> (i32, i32) {
    %c0_i32 = arith.constant 0 : i32
    %c0_i32_0 = arith.constant 0 : i32
    return %arg0, %c0_i32 : i32, i32
  }
  func.func @transform_1(%arg0: i32) -> (i32, i32) {
    %c0_i32 = arith.constant 0 : i32
    %c0_i32_0 = arith.constant 0 : i32
    %c0_i32_1 = arith.constant 0 : i32
    return %c0_i32, %c0_i32_0 : i32, i32
  }
  func.func @transform_2(%arg0: i32) -> (i32, i32) {
    %c0_i32 = arith.constant 0 : i32
    %c0_i32_0 = arith.constant 0 : i32
    %c0_i32_1 = arith.constant 0 : i32
    return %c0_i32, %c0_i32_0 : i32, i32
  }
  func.func @transform_3(%arg0: i32) -> (i32, i32) {
    %c0_i32 = arith.constant 0 : i32
    %c0_i32_0 = arith.constant 0 : i32
    return %arg0, %c0_i32 : i32, i32
  }
}

</mosaic_0001>

<bundles_post_ra>
// kernel: basic_conv2d.1
= control target key start
LH: loop header
LB: loop body
LE: loop exit
PB: predicated region body
PF: predicated region fallthrough
CT: control target
= control target key end

     0   :  { %s1381_s1 = inlined_call_operand.vmem [shape: bf16[128,128], index: 1, kind: input, shape index: {}]   ;;  %s1382_s0 = inlined_call_operand.vmem [shape: bf16[512,128], index: 0, kind: input, shape index: {}]   ;;  %s1383_s2 = inlined_call_operand.vmem [shape: f32[1,128], index: 2, kind: input, shape index: {}]   ;;  %s1384_s3 = inlined_call_operand.vmem [shape: f32[512,128], index: 3, kind: output, shape index: {}]  }
   0x1   :  { %v940_v0 = vld [vmem:[%s1381_s1] sm:$0xff]   ;;  %v941_v1 = vld [vmem:[%s1381_s1 + $0x8] sm:$0xff]   ;;  %v942_v2 = vld [vmem:[%s1381_s1 + $0x10] sm:$0xff]  }
   0x2   :  { %844 = vmatprep.subr.bf16.mxu0 %v940_v0  ;;  %924 = vmatprep.subr.bf16.mxu1 %v940_v0  ;;  %v943_v3 = vld [vmem:[%s1381_s1 + $0x18] sm:$0xff]   ;;  %v948_v4 = vld [vmem:[%s1382_s0] sm:$0xff]   ;;  %v945_v7 = vld [vmem:[%s1381_s1 + $0x28] sm:$0xff]  }
   0x3   :  { %845 = vmatpush3.bf16.msra.mxu0 %v940_v0  ;;  %932 = vmatpush3.bf16.msra.mxu1 %v940_v0  ;;  %v949_v5 = vld [vmem:[%s1382_s0 + $0x80] sm:$0xff]   ;;  %v946_v8 = vld [vmem:[%s1381_s1 + $0x30] sm:$0xff]   ;;  %v947_v9 = vld [vmem:[%s1381_s1 + $0x38] sm:$0xff]  }
   0x4   :  { %846 = vmatprep.subr.bf16.mxu0 %v941_v1  ;;  %925 = vmatprep.subr.bf16.mxu1 %v941_v1  ;;  %v944_v6 = vld [vmem:[%s1381_s1 + $0x20] sm:$0xff]   ;;  %v950_v10 = vld [vmem:[%s1382_s0 + $0x8] sm:$0xff]   ;;  %v952_v12 = vld [vmem:[%s1382_s0 + $0x10] sm:$0xff]  }
   0x5   :  { %860 = vmatprep.mubr.bf16.mxu0 %v948_v4  ;;  %892 = vmatprep.mubr.bf16.mxu1 %v949_v5  ;;  %v951_v11 = vld [vmem:[%s1382_s0 + $0x88] sm:$0xff]   ;;  %v953_v13 = vld [vmem:[%s1382_s0 + $0x90] sm:$0xff]   ;;  %v954_v14 = vld [vmem:[%s1382_s0 + $0x18] sm:$0xff]  }
   0x6   :  { %v955_v15 = vld [vmem:[%s1382_s0 + $0x98] sm:$0xff]   ;;  %v956_v16 = vld [vmem:[%s1382_s0 + $0x20] sm:$0xff]   ;;  %v958_v18 = vld [vmem:[%s1382_s0 + $0x28] sm:$0xff]  }
   0x7   :  { %847 = vmatpush3.bf16.msra.mxu0 %v941_v1  ;;  %933 = vmatpush3.bf16.msra.mxu1 %v941_v1  ;;  %v957_v17 = vld [vmem:[%s1382_s0 + $0xa0] sm:$0xff]   ;;  %v959_v19 = vld [vmem:[%s1382_s0 + $0xa8] sm:$0xff]   ;;  %v960_v20 = vld [vmem:[%s1382_s0 + $0x30] sm:$0xff]  }
   0x8   :  { %848 = vmatprep.subr.bf16.mxu0 %v942_v2  ;;  %926 = vmatprep.subr.bf16.mxu1 %v942_v2  ;;  %v961_v21 = vld [vmem:[%s1382_s0 + $0xb0] sm:$0xff]   ;;  %v962_v22 = vld [vmem:[%s1382_s0 + $0x38] sm:$0xff]   ;;  %v964_v24 = vld [vmem:[%s1382_s0 + $0x40] sm:$0xff]  }
   0x9   :  { %v963_v23 = vld [vmem:[%s1382_s0 + $0xb8] sm:$0xff]   ;;  %v965_v25 = vld [vmem:[%s1382_s0 + $0xc0] sm:$0xff]   ;;  %v966_v26 = vld [vmem:[%s1382_s0 + $0x48] sm:$0xff]  }
   0xa   :  { %v967_v27 = vld [vmem:[%s1382_s0 + $0xc8] sm:$0xff]   ;;  %v968_v28 = vld [vmem:[%s1382_s0 + $0x50] sm:$0xff]   ;;  %v970_v30 = vld [vmem:[%s1382_s0 + $0x58] sm:$0xff]  }
   0xb   :  { %849 = vmatpush3.bf16.msra.mxu0 %v942_v2  ;;  %934 = vmatpush3.bf16.msra.mxu1 %v942_v2  ;;  %v969_v29 = vld [vmem:[%s1382_s0 + $0xd0] sm:$0xff]   ;;  %v971_v31 = vld [vmem:[%s1382_s0 + $0xd8] sm:$0xff]   ;;  %v972_v32 = vld [vmem:[%s1382_s0 + $0x60] sm:$0xff]  }
   0xc   :  { %850 = vmatprep.subr.bf16.mxu0 %v943_v3  ;;  %927 = vmatprep.subr.bf16.mxu1 %v943_v3  ;;  %v973_v33 = vld [vmem:[%s1382_s0 + $0xe0] sm:$0xff]   ;;  %v974_v34 = vld [vmem:[%s1382_s0 + $0x68] sm:$0xff]   ;;  %v976_v36 = vld [vmem:[%s1382_s0 + $0x70] sm:$0xff]  }
   0xd   :  { %v975_v35 = vld [vmem:[%s1382_s0 + $0xe8] sm:$0xff]   ;;  %v977_v37 = vld [vmem:[%s1382_s0 + $0xf0] sm:$0xff]   ;;  %v978_v38 = vld [vmem:[%s1382_s0 + $0x78] sm:$0xff]  }
   0xe   :  { %v979_v39 = vld [vmem:[%s1382_s0 + $0xf8] sm:$0xff]   ;;  %v1123_v40 = vld [vmem:[%s1383_s2] ss:$0 sm:$0xff] }
   0xf   :  { %851 = vmatpush3.bf16.msra.mxu0 %v943_v3  ;;  %935 = vmatpush3.bf16.msra.mxu1 %v943_v3 }
  0x10   :  { %852 = vmatprep.subr.bf16.mxu0 %v944_v6  ;;  %928 = vmatprep.subr.bf16.mxu1 %v944_v6 }
  0x13   :  { %853 = vmatpush3.bf16.msra.mxu0 %v944_v6  ;;  %936 = vmatpush3.bf16.msra.mxu1 %v944_v6 }
  0x14   :  { %854 = vmatprep.subr.bf16.mxu0 %v945_v7  ;;  %929 = vmatprep.subr.bf16.mxu1 %v945_v7 }
  0x17   :  { %855 = vmatpush3.bf16.msra.mxu0 %v945_v7  ;;  %937 = vmatpush3.bf16.msra.mxu1 %v945_v7 }
  0x18   :  { %856 = vmatprep.subr.bf16.mxu0 %v946_v8  ;;  %930 = vmatprep.subr.bf16.mxu1 %v946_v8 }
  0x1b   :  { %857 = vmatpush3.bf16.msra.mxu0 %v946_v8  ;;  %938 = vmatpush3.bf16.msra.mxu1 %v946_v8 }
  0x1c   :  { %858 = vmatprep.subr.bf16.mxu0 %v947_v9  ;;  %931 = vmatprep.subr.bf16.mxu1 %v947_v9 }
  0x1f   :  { %859 = vmatpush3.bf16.msra.mxu0 %v947_v9  ;;  %939 = vmatpush3.bf16.msra.mxu1 %v947_v9 }
  0x22   :  { %861 = vmatmul.mubr.bf16.vlgmr.msra.gmra.mrb[0].mxu0 %v950_v10  ;;  %893 = vmatmul.mubr.bf16.vlgmr.msra.gmra.mrb[0].mxu1 %v951_v11 }
  0x23   :  { %864 = vmatprep.mubr.bf16.mxu0 %v952_v12  ;;  %896 = vmatprep.mubr.bf16.mxu1 %v953_v13 }
  0x2a   :  { %865 = vmatmul.mubr.bf16.gmra.mrb[4].mxu0 %v954_v14  ;;  %897 = vmatmul.mubr.bf16.gmra.mrb[4].mxu1 %v955_v15 }
  0x2b   :  { %868 = vmatprep.mubr.bf16.mxu0 %v956_v16  ;;  %900 = vmatprep.mubr.bf16.mxu1 %v957_v17 }
  0x32   :  { %869 = vmatmul.mubr.bf16.gmra.mrb[8].mxu0 %v958_v18  ;;  %901 = vmatmul.mubr.bf16.gmra.mrb[8].mxu1 %v959_v19 }
  0x33   :  { %872 = vmatprep.mubr.bf16.mxu0 %v960_v20  ;;  %904 = vmatprep.mubr.bf16.mxu1 %v961_v21 }
  0x3a   :  { %873 = vmatmul.mubr.bf16.gmra.mrb[12].mxu0 %v962_v22  ;;  %905 = vmatmul.mubr.bf16.gmra.mrb[12].mxu1 %v963_v23 }
  0x3b   :  { %876 = vmatprep.mubr.bf16.mxu0 %v964_v24  ;;  %908 = vmatprep.mubr.bf16.mxu1 %v965_v25 }
  0x42   :  { %877 = vmatmul.mubr.bf16.gmra.mrb[16].mxu0 %v966_v26  ;;  %909 = vmatmul.mubr.bf16.gmra.mrb[16].mxu1 %v967_v27 }
  0x43   :  { %880 = vmatprep.mubr.bf16.mxu0 %v968_v28  ;;  %912 = vmatprep.mubr.bf16.mxu1 %v969_v29 }
  0x4a   :  { %881 = vmatmul.mubr.bf16.gmra.mrb[20].mxu0 %v970_v30  ;;  %913 = vmatmul.mubr.bf16.gmra.mrb[20].mxu1 %v971_v31 }
  0x4b   :  { %884 = vmatprep.mubr.bf16.mxu0 %v972_v32  ;;  %916 = vmatprep.mubr.bf16.mxu1 %v973_v33 }
  0x52   :  { %885 = vmatmul.mubr.bf16.gmra.mrb[24].mxu0 %v974_v34  ;;  %917 = vmatmul.mubr.bf16.gmra.mrb[24].mxu1 %v975_v35 }
  0x53   :  { %888 = vmatprep.mubr.bf16.mxu0 %v976_v36  ;;  %920 = vmatprep.mubr.bf16.mxu1 %v977_v37 }
  0x5a   :  { %889 = vmatmul.mubr.bf16.gmra.mrb[28].mxu0 %v978_v38  ;;  %921 = vmatmul.mubr.bf16.gmra.mrb[28].mxu1 %v979_v39 }
  0xf5   :  { %v862_v41 = vpop.f32.mrb[0].mxu0  ;;  %v894_v42 = vpop.f32.mrb[0].mxu1 }
  0xf6   :  { %v385_v43 = vadd.f32 %v862_v41, %v1123_v40  ;;  %v513_v44 = vadd.f32 %v894_v42, %v1123_v40  ;;  %v376_v45 = vpop.f32.mrb[1].mxu0  ;;  %v504_v46 = vpop.f32.mrb[1].mxu1 }
  0xf7   :  { %v377_v47 = vadd.f32 %v1123_v40, %v376_v45  ;;  %v505_v48 = vadd.f32 %v1123_v40, %v504_v46  ;;  %v863_v49 = vpop.f32.mrb[2].mxu0  ;;  %v895_v50 = vpop.f32.mrb[2].mxu1 }
  0xf8   :  { %v633_v51 = vmax.f32 %v385_v43, 0.0  ;;  %v665_v52 = vmax.f32 %v513_v44, 0.0  ;;  %v388_v53 = vadd.f32 %v863_v49, %v1123_v40  ;;  %v516_v54 = vadd.f32 %v895_v50, %v1123_v40  ;;  %v379_v55 = vpop.f32.mrb[3].mxu0  ;;  %v507_v56 = vpop.f32.mrb[3].mxu1 }
  0xf9   :  { %v631_v57 = vmax.f32 %v377_v47, 0.0  ;;  %v663_v58 = vmax.f32 %v505_v48, 0.0  ;;  %v380_v59 = vadd.f32 %v1123_v40, %v379_v55  ;;  %v508_v60 = vadd.f32 %v1123_v40, %v507_v56 }
  0xfa   :  { %697 = vst [vmem:[%s1384_s3 + $0x10] sm:$0xff] %v633_v51  ;;  %729 = vst [vmem:[%s1384_s3 + $0x110] sm:$0xff] %v665_v52  ;;  %v634_v61 = vmax.f32 %v388_v53, 0.0  ;;  %v666_v62 = vmax.f32 %v516_v54, 0.0 }
  0xfb   :  { %695 = vst [vmem:[%s1384_s3] sm:$0xff] %v631_v57  ;;  %727 = vst [vmem:[%s1384_s3 + $0x100] sm:$0xff] %v663_v58  ;;  %v632_v63 = vmax.f32 %v380_v59, 0.0  ;;  %v664_v0 = vmax.f32 %v508_v60, 0.0 }
  0xfc   :  { %698 = vst [vmem:[%s1384_s3 + $0x18] sm:$0xff] %v634_v61  ;;  %730 = vst [vmem:[%s1384_s3 + $0x118] sm:$0xff] %v666_v62 }
  0xfd   :  { %696 = vst [vmem:[%s1384_s3 + $0x8] sm:$0xff] %v632_v63  ;;  %728 = vst [vmem:[%s1384_s3 + $0x108] sm:$0xff] %v664_v0  ;;  %v866_v1 = vpop.f32.mrb[4].mxu0  ;;  %v898_v2 = vpop.f32.mrb[4].mxu1 }
  0xfe   :  { %v401_v3 = vadd.f32 %v866_v1, %v1123_v40  ;;  %v529_v4 = vadd.f32 %v898_v2, %v1123_v40  ;;  %v392_v5 = vpop.f32.mrb[5].mxu0  ;;  %v520_v6 = vpop.f32.mrb[5].mxu1 }
  0xff   :  { %v393_v7 = vadd.f32 %v1123_v40, %v392_v5  ;;  %v521_v8 = vadd.f32 %v1123_v40, %v520_v6  ;;  %v867_v9 = vpop.f32.mrb[6].mxu0  ;;  %v899_v10 = vpop.f32.mrb[6].mxu1 }
 0x100   :  { %v637_v11 = vmax.f32 %v401_v3, 0.0  ;;  %v669_v12 = vmax.f32 %v529_v4, 0.0  ;;  %v404_v13 = vadd.f32 %v867_v9, %v1123_v40  ;;  %v532_v14 = vadd.f32 %v899_v10, %v1123_v40  ;;  %v395_v15 = vpop.f32.mrb[7].mxu0  ;;  %v523_v16 = vpop.f32.mrb[7].mxu1 }
 0x101   :  { %v635_v17 = vmax.f32 %v393_v7, 0.0  ;;  %v667_v18 = vmax.f32 %v521_v8, 0.0  ;;  %v396_v19 = vadd.f32 %v1123_v40, %v395_v15  ;;  %v524_v20 = vadd.f32 %v1123_v40, %v523_v16 }
 0x102   :  { %701 = vst [vmem:[%s1384_s3 + $0x30] sm:$0xff] %v637_v11  ;;  %733 = vst [vmem:[%s1384_s3 + $0x130] sm:$0xff] %v669_v12  ;;  %v638_v21 = vmax.f32 %v404_v13, 0.0  ;;  %v670_v22 = vmax.f32 %v532_v14, 0.0 }
 0x103   :  { %699 = vst [vmem:[%s1384_s3 + $0x20] sm:$0xff] %v635_v17  ;;  %731 = vst [vmem:[%s1384_s3 + $0x120] sm:$0xff] %v667_v18  ;;  %v636_v23 = vmax.f32 %v396_v19, 0.0  ;;  %v668_v24 = vmax.f32 %v524_v20, 0.0 }
 0x104   :  { %702 = vst [vmem:[%s1384_s3 + $0x38] sm:$0xff] %v638_v21  ;;  %734 = vst [vmem:[%s1384_s3 + $0x138] sm:$0xff] %v670_v22 }
 0x105   :  { %700 = vst [vmem:[%s1384_s3 + $0x28] sm:$0xff] %v636_v23  ;;  %732 = vst [vmem:[%s1384_s3 + $0x128] sm:$0xff] %v668_v24  ;;  %v870_v25 = vpop.f32.mrb[8].mxu0  ;;  %v902_v26 = vpop.f32.mrb[8].mxu1 }
 0x106   :  { %v417_v27 = vadd.f32 %v870_v25, %v1123_v40  ;;  %v545_v28 = vadd.f32 %v902_v26, %v1123_v40  ;;  %v408_v29 = vpop.f32.mrb[9].mxu0  ;;  %v536_v30 = vpop.f32.mrb[9].mxu1 }
 0x107   :  { %v409_v31 = vadd.f32 %v1123_v40, %v408_v29  ;;  %v537_v32 = vadd.f32 %v1123_v40, %v536_v30  ;;  %v871_v33 = vpop.f32.mrb[10].mxu0  ;;  %v903_v34 = vpop.f32.mrb[10].mxu1 }
 0x108   :  { %v641_v35 = vmax.f32 %v417_v27, 0.0  ;;  %v673_v36 = vmax.f32 %v545_v28, 0.0  ;;  %v420_v37 = vadd.f32 %v871_v33, %v1123_v40  ;;  %v548_v38 = vadd.f32 %v903_v34, %v1123_v40  ;;  %v411_v39 = vpop.f32.mrb[11].mxu0  ;;  %v539_v41 = vpop.f32.mrb[11].mxu1 }
 0x109   :  { %v639_v42 = vmax.f32 %v409_v31, 0.0  ;;  %v671_v43 = vmax.f32 %v537_v32, 0.0  ;;  %v412_v44 = vadd.f32 %v1123_v40, %v411_v39  ;;  %v540_v45 = vadd.f32 %v1123_v40, %v539_v41 }
 0x10a   :  { %705 = vst [vmem:[%s1384_s3 + $0x50] sm:$0xff] %v641_v35  ;;  %737 = vst [vmem:[%s1384_s3 + $0x150] sm:$0xff] %v673_v36  ;;  %v642_v46 = vmax.f32 %v420_v37, 0.0  ;;  %v674_v47 = vmax.f32 %v548_v38, 0.0 }
 0x10b   :  { %703 = vst [vmem:[%s1384_s3 + $0x40] sm:$0xff] %v639_v42  ;;  %735 = vst [vmem:[%s1384_s3 + $0x140] sm:$0xff] %v671_v43  ;;  %v640_v48 = vmax.f32 %v412_v44, 0.0  ;;  %v672_v49 = vmax.f32 %v540_v45, 0.0 }
 0x10c   :  { %706 = vst [vmem:[%s1384_s3 + $0x58] sm:$0xff] %v642_v46  ;;  %738 = vst [vmem:[%s1384_s3 + $0x158] sm:$0xff] %v674_v47 }
 0x10d   :  { %704 = vst [vmem:[%s1384_s3 + $0x48] sm:$0xff] %v640_v48  ;;  %736 = vst [vmem:[%s1384_s3 + $0x148] sm:$0xff] %v672_v49  ;;  %v874_v50 = vpop.f32.mrb[12].mxu0  ;;  %v906_v51 = vpop.f32.mrb[12].mxu1 }
 0x10e   :  { %v433_v52 = vadd.f32 %v874_v50, %v1123_v40  ;;  %v561_v53 = vadd.f32 %v906_v51, %v1123_v40  ;;  %v424_v54 = vpop.f32.mrb[13].mxu0  ;;  %v552_v55 = vpop.f32.mrb[13].mxu1 }
 0x10f   :  { %v425_v56 = vadd.f32 %v1123_v40, %v424_v54  ;;  %v553_v57 = vadd.f32 %v1123_v40, %v552_v55  ;;  %v875_v58 = vpop.f32.mrb[14].mxu0  ;;  %v907_v59 = vpop.f32.mrb[14].mxu1 }
 0x110   :  { %v645_v60 = vmax.f32 %v433_v52, 0.0  ;;  %v677_v61 = vmax.f32 %v561_v53, 0.0  ;;  %v436_v62 = vadd.f32 %v875_v58, %v1123_v40  ;;  %v564_v63 = vadd.f32 %v907_v59, %v1123_v40  ;;  %v427_v0 = vpop.f32.mrb[15].mxu0  ;;  %v555_v1 = vpop.f32.mrb[15].mxu1 }
 0x111   :  { %v643_v2 = vmax.f32 %v425_v56, 0.0  ;;  %v675_v3 = vmax.f32 %v553_v57, 0.0  ;;  %v428_v4 = vadd.f32 %v1123_v40, %v427_v0  ;;  %v556_v5 = vadd.f32 %v1123_v40, %v555_v1 }
 0x112   :  { %709 = vst [vmem:[%s1384_s3 + $0x70] sm:$0xff] %v645_v60  ;;  %741 = vst [vmem:[%s1384_s3 + $0x170] sm:$0xff] %v677_v61  ;;  %v646_v6 = vmax.f32 %v436_v62, 0.0  ;;  %v678_v7 = vmax.f32 %v564_v63, 0.0 }
 0x113   :  { %707 = vst [vmem:[%s1384_s3 + $0x60] sm:$0xff] %v643_v2  ;;  %739 = vst [vmem:[%s1384_s3 + $0x160] sm:$0xff] %v675_v3  ;;  %v644_v8 = vmax.f32 %v428_v4, 0.0  ;;  %v676_v9 = vmax.f32 %v556_v5, 0.0 }
 0x114   :  { %710 = vst [vmem:[%s1384_s3 + $0x78] sm:$0xff] %v646_v6  ;;  %742 = vst [vmem:[%s1384_s3 + $0x178] sm:$0xff] %v678_v7 }
 0x115   :  { %708 = vst [vmem:[%s1384_s3 + $0x68] sm:$0xff] %v644_v8  ;;  %740 = vst [vmem:[%s1384_s3 + $0x168] sm:$0xff] %v676_v9  ;;  %v878_v10 = vpop.f32.mrb[16].mxu0  ;;  %v910_v11 = vpop.f32.mrb[16].mxu1 }
 0x116   :  { %v449_v12 = vadd.f32 %v878_v10, %v1123_v40  ;;  %v577_v13 = vadd.f32 %v910_v11, %v1123_v40  ;;  %v440_v14 = vpop.f32.mrb[17].mxu0  ;;  %v568_v15 = vpop.f32.mrb[17].mxu1 }
 0x117   :  { %v441_v16 = vadd.f32 %v1123_v40, %v440_v14  ;;  %v569_v17 = vadd.f32 %v1123_v40, %v568_v15  ;;  %v879_v18 = vpop.f32.mrb[18].mxu0  ;;  %v911_v19 = vpop.f32.mrb[18].mxu1 }
 0x118   :  { %v649_v20 = vmax.f32 %v449_v12, 0.0  ;;  %v681_v21 = vmax.f32 %v577_v13, 0.0  ;;  %v452_v22 = vadd.f32 %v879_v18, %v1123_v40  ;;  %v580_v23 = vadd.f32 %v911_v19, %v1123_v40  ;;  %v443_v24 = vpop.f32.mrb[19].mxu0  ;;  %v571_v25 = vpop.f32.mrb[19].mxu1 }
 0x119   :  { %v647_v26 = vmax.f32 %v441_v16, 0.0  ;;  %v679_v27 = vmax.f32 %v569_v17, 0.0  ;;  %v444_v28 = vadd.f32 %v1123_v40, %v443_v24  ;;  %v572_v29 = vadd.f32 %v1123_v40, %v571_v25 }
 0x11a   :  { %713 = vst [vmem:[%s1384_s3 + $0x90] sm:$0xff] %v649_v20  ;;  %745 = vst [vmem:[%s1384_s3 + $0x190] sm:$0xff] %v681_v21  ;;  %v650_v30 = vmax.f32 %v452_v22, 0.0  ;;  %v682_v31 = vmax.f32 %v580_v23, 0.0 }
 0x11b   :  { %711 = vst [vmem:[%s1384_s3 + $0x80] sm:$0xff] %v647_v26  ;;  %743 = vst [vmem:[%s1384_s3 + $0x180] sm:$0xff] %v679_v27  ;;  %v648_v32 = vmax.f32 %v444_v28, 0.0  ;;  %v680_v33 = vmax.f32 %v572_v29, 0.0 }
 0x11c   :  { %714 = vst [vmem:[%s1384_s3 + $0x98] sm:$0xff] %v650_v30  ;;  %746 = vst [vmem:[%s1384_s3 + $0x198] sm:$0xff] %v682_v31 }
 0x11d   :  { %712 = vst [vmem:[%s1384_s3 + $0x88] sm:$0xff] %v648_v32  ;;  %744 = vst [vmem:[%s1384_s3 + $0x188] sm:$0xff] %v680_v33  ;;  %v882_v34 = vpop.f32.mrb[20].mxu0  ;;  %v914_v35 = vpop.f32.mrb[20].mxu1 }
 0x11e   :  { %v465_v36 = vadd.f32 %v882_v34, %v1123_v40  ;;  %v593_v37 = vadd.f32 %v914_v35, %v1123_v40  ;;  %v456_v38 = vpop.f32.mrb[21].mxu0  ;;  %v584_v39 = vpop.f32.mrb[21].mxu1 }
 0x11f   :  { %v457_v41 = vadd.f32 %v1123_v40, %v456_v38  ;;  %v585_v42 = vadd.f32 %v1123_v40, %v584_v39  ;;  %v883_v43 = vpop.f32.mrb[22].mxu0  ;;  %v915_v44 = vpop.f32.mrb[22].mxu1 }
 0x120   :  { %v653_v45 = vmax.f32 %v465_v36, 0.0  ;;  %v685_v46 = vmax.f32 %v593_v37, 0.0  ;;  %v468_v47 = vadd.f32 %v883_v43, %v1123_v40  ;;  %v596_v48 = vadd.f32 %v915_v44, %v1123_v40  ;;  %v459_v49 = vpop.f32.mrb[23].mxu0  ;;  %v587_v50 = vpop.f32.mrb[23].mxu1 }
 0x121   :  { %v651_v51 = vmax.f32 %v457_v41, 0.0  ;;  %v683_v52 = vmax.f32 %v585_v42, 0.0  ;;  %v460_v53 = vadd.f32 %v1123_v40, %v459_v49  ;;  %v588_v54 = vadd.f32 %v1123_v40, %v587_v50 }
 0x122   :  { %717 = vst [vmem:[%s1384_s3 + $0xb0] sm:$0xff] %v653_v45  ;;  %749 = vst [vmem:[%s1384_s3 + $0x1b0] sm:$0xff] %v685_v46  ;;  %v654_v55 = vmax.f32 %v468_v47, 0.0  ;;  %v686_v56 = vmax.f32 %v596_v48, 0.0 }
 0x123   :  { %715 = vst [vmem:[%s1384_s3 + $0xa0] sm:$0xff] %v651_v51  ;;  %747 = vst [vmem:[%s1384_s3 + $0x1a0] sm:$0xff] %v683_v52  ;;  %v652_v57 = vmax.f32 %v460_v53, 0.0  ;;  %v684_v58 = vmax.f32 %v588_v54, 0.0 }
 0x124   :  { %718 = vst [vmem:[%s1384_s3 + $0xb8] sm:$0xff] %v654_v55  ;;  %750 = vst [vmem:[%s1384_s3 + $0x1b8] sm:$0xff] %v686_v56 }
 0x125   :  { %716 = vst [vmem:[%s1384_s3 + $0xa8] sm:$0xff] %v652_v57  ;;  %748 = vst [vmem:[%s1384_s3 + $0x1a8] sm:$0xff] %v684_v58  ;;  %v886_v59 = vpop.f32.mrb[24].mxu0  ;;  %v918_v60 = vpop.f32.mrb[24].mxu1 }
 0x126   :  { %v481_v61 = vadd.f32 %v886_v59, %v1123_v40  ;;  %v609_v62 = vadd.f32 %v918_v60, %v1123_v40  ;;  %v472_v63 = vpop.f32.mrb[25].mxu0  ;;  %v600_v0 = vpop.f32.mrb[25].mxu1 }
 0x127   :  { %v473_v1 = vadd.f32 %v1123_v40, %v472_v63  ;;  %v601_v2 = vadd.f32 %v1123_v40, %v600_v0  ;;  %v887_v3 = vpop.f32.mrb[26].mxu0  ;;  %v919_v4 = vpop.f32.mrb[26].mxu1 }
 0x128   :  { %v657_v5 = vmax.f32 %v481_v61, 0.0  ;;  %v689_v6 = vmax.f32 %v609_v62, 0.0  ;;  %v484_v7 = vadd.f32 %v887_v3, %v1123_v40  ;;  %v612_v8 = vadd.f32 %v919_v4, %v1123_v40  ;;  %v475_v9 = vpop.f32.mrb[27].mxu0  ;;  %v603_v10 = vpop.f32.mrb[27].mxu1 }
 0x129   :  { %v655_v11 = vmax.f32 %v473_v1, 0.0  ;;  %v687_v12 = vmax.f32 %v601_v2, 0.0  ;;  %v476_v13 = vadd.f32 %v1123_v40, %v475_v9  ;;  %v604_v14 = vadd.f32 %v1123_v40, %v603_v10 }
 0x12a   :  { %721 = vst [vmem:[%s1384_s3 + $0xd0] sm:$0xff] %v657_v5  ;;  %753 = vst [vmem:[%s1384_s3 + $0x1d0] sm:$0xff] %v689_v6  ;;  %v658_v15 = vmax.f32 %v484_v7, 0.0  ;;  %v690_v16 = vmax.f32 %v612_v8, 0.0 }
 0x12b   :  { %719 = vst [vmem:[%s1384_s3 + $0xc0] sm:$0xff] %v655_v11  ;;  %751 = vst [vmem:[%s1384_s3 + $0x1c0] sm:$0xff] %v687_v12  ;;  %v656_v17 = vmax.f32 %v476_v13, 0.0  ;;  %v688_v18 = vmax.f32 %v604_v14, 0.0 }
 0x12c   :  { %722 = vst [vmem:[%s1384_s3 + $0xd8] sm:$0xff] %v658_v15  ;;  %754 = vst [vmem:[%s1384_s3 + $0x1d8] sm:$0xff] %v690_v16 }
 0x12d   :  { %720 = vst [vmem:[%s1384_s3 + $0xc8] sm:$0xff] %v656_v17  ;;  %752 = vst [vmem:[%s1384_s3 + $0x1c8] sm:$0xff] %v688_v18  ;;  %v890_v19 = vpop.f32.mrb[28].mxu0  ;;  %v922_v20 = vpop.f32.mrb[28].mxu1 }
 0x12e   :  { %v497_v21 = vadd.f32 %v890_v19, %v1123_v40  ;;  %v625_v22 = vadd.f32 %v922_v20, %v1123_v40  ;;  %v488_v23 = vpop.f32.mrb[29].mxu0  ;;  %v616_v24 = vpop.f32.mrb[29].mxu1 }
 0x12f   :  { %v489_v25 = vadd.f32 %v1123_v40, %v488_v23  ;;  %v617_v26 = vadd.f32 %v1123_v40, %v616_v24  ;;  %v891_v27 = vpop.f32.mrb[30].mxu0  ;;  %v923_v28 = vpop.f32.mrb[30].mxu1 }
 0x130   :  { %v661_v29 = vmax.f32 %v497_v21, 0.0  ;;  %v693_v30 = vmax.f32 %v625_v22, 0.0  ;;  %v500_v31 = vadd.f32 %v891_v27, %v1123_v40  ;;  %v628_v32 = vadd.f32 %v923_v28, %v1123_v40  ;;  %v491_v33 = vpop.f32.mrb[31].mxu0  ;;  %v619_v34 = vpop.f32.mrb[31].mxu1 }
 0x131   :  { %v659_v35 = vmax.f32 %v489_v25, 0.0  ;;  %v691_v36 = vmax.f32 %v617_v26, 0.0  ;;  %v492_v37 = vadd.f32 %v1123_v40, %v491_v33  ;;  %v620_v38 = vadd.f32 %v1123_v40, %v619_v34 }
 0x132   :  { %725 = vst [vmem:[%s1384_s3 + $0xf0] sm:$0xff] %v661_v29  ;;  %757 = vst [vmem:[%s1384_s3 + $0x1f0] sm:$0xff] %v693_v30  ;;  %v662_v39 = vmax.f32 %v500_v31, 0.0  ;;  %v694_v41 = vmax.f32 %v628_v32, 0.0 }
 0x133   :  { %723 = vst [vmem:[%s1384_s3 + $0xe0] sm:$0xff] %v659_v35  ;;  %755 = vst [vmem:[%s1384_s3 + $0x1e0] sm:$0xff] %v691_v36  ;;  %v660_v42 = vmax.f32 %v492_v37, 0.0  ;;  %v692_v40 = vmax.f32 %v620_v38, 0.0 }
 0x134   :  { %726 = vst [vmem:[%s1384_s3 + $0xf8] sm:$0xff] %v662_v39  ;;  %758 = vst [vmem:[%s1384_s3 + $0x1f8] sm:$0xff] %v694_v41 }
 0x135   :  { %724 = vst [vmem:[%s1384_s3 + $0xe8] sm:$0xff] %v660_v42  ;;  %756 = vst [vmem:[%s1384_s3 + $0x1e8] sm:$0xff] %v692_v40 }

</bundles_post_ra>
